<compile_context>
chip_gen: v7x
topology: tpu7x:2x2x1
jax: 0.10.0
libtpu: 0.0.40
codegen_flags: <defaults>
</compile_context>

<pallas_src>
import math

import jax
import jax.numpy as jnp
from jax.experimental import pallas as pl
from jax.experimental.pallas import tpu as pltpu


def _make_eca_kernel(true_hw):
    """Build the kernel with the true (unpadded) spatial size baked in."""
    inv_hw = 1.0 / float(true_hw)

    def kernel(w_ref, x_ref, o_ref):
        # w_ref: (k,) conv taps in SMEM (scalar prefetch).
        # x_ref, o_ref: (N, C, HWp) VMEM tiles (one block = whole problem).
        N, C, _ = x_ref.shape
        k = w_ref.shape[0]
        pad = (k - 1) // 2
        ch = jax.lax.broadcasted_iota(jnp.int32, (C, 1), 0)      # channel index

        # N is small and static -> unrolled Python loop (no per-step grid overhead).
        for n in range(N):
            xn = x_ref[n].astype(jnp.float32)                    # (C, HWp), loaded once

            # 1) Global average pool: lane reduce; padded lanes are zero so they
            #    don't contribute; divide by the TRUE HW.
            pooled = jnp.sum(xn, axis=-1, keepdims=True) * inv_hw  # (C, 1)

            # 2) k-tap channel conv (cross-correlation, zero "same" padding):
            #      y[c] = sum_j w[j] * pooled[c + j - pad]
            #    via static sublane rotations + edge masks (VPU/XLU only).
            y = jnp.zeros((C, 1), jnp.float32)
            for j in range(k):                                   # k static -> unrolled
                s = j - pad
                if s == 0:
                    contrib = pooled
                else:
                    # rolled[c] = pooled[(c + s) mod C]; mask kills wrapped entries.
                    rolled = pltpu.roll(pooled, shift=(-s) % C, axis=0)
                    valid = (ch + s >= 0) & (ch + s < C)
                    contrib = jnp.where(valid, rolled, 0.0)
                y = y + w_ref[j] * contrib

            # 3) Sigmoid gate (f32), broadcast multiply, cast back to I/O dtype.
            gate = jax.nn.sigmoid(y)                             # (C, 1)
            o_ref[n] = (xn * gate).astype(o_ref.dtype)

    return kernel


def eca_block_pallas(x, conv_weight):
    """x: (N, C, H, W) f32 or bf16.  conv_weight: (k,) Conv1d(1,1,k,bias=False) weight."""
    N, C, H, W = x.shape
    HW = H * W
    x2 = x.reshape(N, C, HW)                   # free for contiguous NCHW

    # Lane-density guard: keep the last (lane) dim a multiple of 128.
    HWp = max(128, ((HW + 127) // 128) * 128)
    if HWp != HW:
        x2 = jnp.pad(x2, ((0, 0), (0, 0), (0, HWp - HW)))

    out = pl.pallas_call(
        _make_eca_kernel(HW),
        out_shape=jax.ShapeDtypeStruct((N, C, HWp), x.dtype),
        grid_spec=pltpu.PrefetchScalarGridSpec(
            num_scalar_prefetch=1,             # conv taps -> SMEM
            grid=(1,),                         # single step: whole problem in one block
            in_specs=[pl.BlockSpec((N, C, HWp), lambda i, w: (0, 0, 0))],
            out_specs=pl.BlockSpec((N, C, HWp), lambda i, w: (0, 0, 0)),
        ),
        compiler_params=pltpu.CompilerParams(
            dimension_semantics=("arbitrary",)),
        input_output_aliases={1: 0},           # out aliases x2 (arg 0 is the taps)
    )(conv_weight.astype(jnp.float32), x2)

    if HWp != HW:
        out = out[:, :, :HW]
    return out.reshape(N, C, H, W)


def eca_block_ref(x, conv_weight):
    """Pure-JAX reference matching the PyTorch forward (Conv1d cross-correlation)."""
    N, C, H, W = x.shape
    k = conv_weight.shape[0]
    pad = (k - 1) // 2
    pooled = jnp.mean(x.astype(jnp.float32), axis=(2, 3))   # (N, C)
    padded = jnp.pad(pooled, ((0, 0), (pad, pad)))          # zero pad channels
    y = jnp.zeros_like(pooled)
    for j in range(k):
        y = y + conv_weight[j] * padded[:, j:j + C]
    gate = jax.nn.sigmoid(y)                                # (N, C)
    return x.astype(jnp.float32) * gate[:, :, None, None]


if __name__ == "__main__":
    # Module config: channel=16 -> kernel_size = 3 (as computed in __init__).
    channel, b, gamma = 16, 1, 2
    kernel_size = int(abs((math.log(channel, 2) + b) / gamma))
    kernel_size = kernel_size if kernel_size % 2 else kernel_size + 1

    key = jax.random.PRNGKey(0)
    kx, kw = jax.random.split(key)
    N, C, H, W = 2, channel, 16, 16
    x = jax.random.normal(kx, (N, C, H, W), dtype=jnp.float32)
    # Deterministic Conv1d(1, 1, k, bias=False) weight (flattened to (k,)).
    bound = 1.0 / math.sqrt(kernel_size)
    conv_w = jax.random.uniform(kw, (kernel_size,), dtype=jnp.float32,
                                minval=-bound, maxval=bound)

    # f32 path
    out = jax.block_until_ready(eca_block_pallas(x, conv_w))
    ref = eca_block_ref(x, conv_w)
    assert out.shape == (N, C, H, W)
    assert jnp.allclose(out, ref, atol=2e-5, rtol=2e-5), "f32 mismatch vs reference"

    # bf16 I/O path (halves streamed HBM bytes on v6e/v7x; math stays f32 in-kernel)
    x_bf16 = x.astype(jnp.bfloat16)
    out_bf16 = jax.block_until_ready(eca_block_pallas(x_bf16, conv_w))
    ref_bf16 = eca_block_ref(x_bf16, conv_w)
    assert out_bf16.dtype == jnp.bfloat16
    assert jnp.allclose(out_bf16.astype(jnp.float32), ref_bf16,
                        atol=1e-2, rtol=1e-2), "bf16 mismatch vs reference"

    print("KERNEL_OK")
</pallas_src>

<mosaic_0001>
module attributes {stable_mosaic.version = 11 : i64} {
  func.func @kernel(%arg0: i32, %arg1: memref<3xf32, #tpu.memory_space<smem>>, %arg2: memref<2x16x256xf32, #tpu.memory_space<vmem>>, %arg3: memref<2x16x256xf32, #tpu.memory_space<vmem>>) attributes {dimension_semantics = [#tpu.dimension_semantics<arbitrary>], iteration_bounds = array<i64: 1>, scalar_prefetch = 1 : i64, scratch_operands = 0 : i64, tpu.core_type = #tpu.core_type<tc>, window_params = [{pipeline_mode = #tpu.pipeline_mode<synchronous>, transform_indices = @transform_0, window_bounds = array<i64: 2, 16, 256>}, {pipeline_mode = #tpu.pipeline_mode<synchronous>, transform_indices = @transform_1, window_bounds = array<i64: 2, 16, 256>}]} {
    %0 = tpu.iota {dimensions = array<i32: 0>} : vector<16x1xi32>
    %c0 = arith.constant 0 : index
    %c0_0 = arith.constant 0 : index
    %c0_1 = arith.constant 0 : index
    %1 = vector.load %arg2[%c0, %c0_0, %c0_1] : memref<2x16x256xf32, #tpu.memory_space<vmem>>, vector<1x16x256xf32>
    %2 = vector.shape_cast %1 : vector<1x16x256xf32> to vector<16x256xf32>
    %cst = arith.constant dense<0.000000e+00> : vector<16xf32>
    %3 = vector.multi_reduction <add>, %2, %cst [1] : vector<16x256xf32> to vector<16xf32>
    %4 = vector.shape_cast %3 : vector<16xf32> to vector<16x1xf32>
    %cst_2 = arith.constant 3.906250e-03 : f32
    %5 = vector.broadcast %cst_2 : f32 to vector<16x1xf32>
    %6 = arith.mulf %4, %5 : vector<16x1xf32>
    %cst_3 = arith.constant 0.000000e+00 : f32
    %7 = vector.broadcast %cst_3 : f32 to vector<16x1xf32>
    %c1_i32 = arith.constant 1 : i32
    %8 = tpu.dynamic_rotate %6 by %c1_i32 dim 0 : vector<16x1xf32>, i32 -> vector<16x1xf32>
    %c-1_i32 = arith.constant -1 : i32
    %9 = vector.broadcast %c-1_i32 : i32 to vector<16x1xi32>
    %10 = arith.addi %0, %9 : vector<16x1xi32>
    %c0_i32 = arith.constant 0 : i32
    %11 = vector.broadcast %c0_i32 : i32 to vector<16x1xi32>
    %12 = arith.cmpi sge, %10, %11 : vector<16x1xi32>
    %c-1_i32_4 = arith.constant -1 : i32
    %13 = vector.broadcast %c-1_i32_4 : i32 to vector<16x1xi32>
    %14 = arith.addi %0, %13 : vector<16x1xi32>
    %c16_i32 = arith.constant 16 : i32
    %15 = vector.broadcast %c16_i32 : i32 to vector<16x1xi32>
    %16 = arith.cmpi slt, %14, %15 : vector<16x1xi32>
    %17 = arith.andi %12, %16 : vector<16x1xi1>
    %cst_5 = arith.constant 0.000000e+00 : f32
    %18 = vector.broadcast %cst_5 : f32 to vector<16x1xf32>
    %19 = arith.select %17, %8, %18 : vector<16x1xi1>, vector<16x1xf32>
    %c0_6 = arith.constant 0 : index
    %20 = memref.load %arg1[%c0_6] : memref<3xf32, #tpu.memory_space<smem>>
    %21 = vector.broadcast %20 : f32 to vector<16x1xf32>
    %22 = arith.mulf %21, %19 : vector<16x1xf32>
    %23 = arith.addf %7, %22 : vector<16x1xf32>
    %c1 = arith.constant 1 : index
    %24 = memref.load %arg1[%c1] : memref<3xf32, #tpu.memory_space<smem>>
    %25 = vector.broadcast %24 : f32 to vector<16x1xf32>
    %26 = arith.mulf %25, %6 : vector<16x1xf32>
    %27 = arith.addf %23, %26 : vector<16x1xf32>
    %c15_i32 = arith.constant 15 : i32
    %28 = tpu.dynamic_rotate %6 by %c15_i32 dim 0 : vector<16x1xf32>, i32 -> vector<16x1xf32>
    %c1_i32_7 = arith.constant 1 : i32
    %29 = vector.broadcast %c1_i32_7 : i32 to vector<16x1xi32>
    %30 = arith.addi %0, %29 : vector<16x1xi32>
    %c0_i32_8 = arith.constant 0 : i32
    %31 = vector.broadcast %c0_i32_8 : i32 to vector<16x1xi32>
    %32 = arith.cmpi sge, %30, %31 : vector<16x1xi32>
    %c1_i32_9 = arith.constant 1 : i32
    %33 = vector.broadcast %c1_i32_9 : i32 to vector<16x1xi32>
    %34 = arith.addi %0, %33 : vector<16x1xi32>
    %c16_i32_10 = arith.constant 16 : i32
    %35 = vector.broadcast %c16_i32_10 : i32 to vector<16x1xi32>
    %36 = arith.cmpi slt, %34, %35 : vector<16x1xi32>
    %37 = arith.andi %32, %36 : vector<16x1xi1>
    %cst_11 = arith.constant 0.000000e+00 : f32
    %38 = vector.broadcast %cst_11 : f32 to vector<16x1xf32>
    %39 = arith.select %37, %28, %38 : vector<16x1xi1>, vector<16x1xf32>
    %c2 = arith.constant 2 : index
    %40 = memref.load %arg1[%c2] : memref<3xf32, #tpu.memory_space<smem>>
    %41 = vector.broadcast %40 : f32 to vector<16x1xf32>
    %42 = arith.mulf %41, %39 : vector<16x1xf32>
    %43 = arith.addf %27, %42 : vector<16x1xf32>
    %44 = arith.negf %43 : vector<16x1xf32>
    %45 = math.exp %44 : vector<16x1xf32>
    %cst_12 = arith.constant 1.000000e+00 : f32
    %46 = vector.broadcast %cst_12 : f32 to vector<16x1xf32>
    %47 = arith.addf %46, %45 : vector<16x1xf32>
    %48 = arith.divf %46, %47 : vector<16x1xf32>
    %49 = vector.broadcast %48 : vector<16x1xf32> to vector<16x256xf32>
    %50 = arith.mulf %2, %49 : vector<16x256xf32>
    %c0_13 = arith.constant 0 : index
    %c0_14 = arith.constant 0 : index
    %c0_15 = arith.constant 0 : index
    %51 = vector.load %arg3[%c0_13, %c0_14, %c0_15] : memref<2x16x256xf32, #tpu.memory_space<vmem>>, vector<1x16x256xf32>
    %52 = vector.shape_cast %51 : vector<1x16x256xf32> to vector<16x256xf32>
    %53 = vector.shape_cast %50 : vector<16x256xf32> to vector<1x16x256xf32>
    tpu.vector_store %arg3[%c0_13, %c0_14, %c0_15], %53 {strides = array<i32>} : memref<2x16x256xf32, #tpu.memory_space<vmem>>, vector<1x16x256xf32>,
    %c1_16 = arith.constant 1 : index
    %c0_17 = arith.constant 0 : index
    %c0_18 = arith.constant 0 : index
    %54 = vector.load %arg2[%c1_16, %c0_17, %c0_18] : memref<2x16x256xf32, #tpu.memory_space<vmem>>, vector<1x16x256xf32>
    %55 = vector.shape_cast %54 : vector<1x16x256xf32> to vector<16x256xf32>
    %cst_19 = arith.constant dense<0.000000e+00> : vector<16xf32>
    %56 = vector.multi_reduction <add>, %55, %cst_19 [1] : vector<16x256xf32> to vector<16xf32>
    %57 = vector.shape_cast %56 : vector<16xf32> to vector<16x1xf32>
    %cst_20 = arith.constant 3.906250e-03 : f32
    %58 = vector.broadcast %cst_20 : f32 to vector<16x1xf32>
    %59 = arith.mulf %57, %58 : vector<16x1xf32>
    %cst_21 = arith.constant 0.000000e+00 : f32
    %60 = vector.broadcast %cst_21 : f32 to vector<16x1xf32>
    %c1_i32_22 = arith.constant 1 : i32
    %61 = tpu.dynamic_rotate %59 by %c1_i32_22 dim 0 : vector<16x1xf32>, i32 -> vector<16x1xf32>
    %c-1_i32_23 = arith.constant -1 : i32
    %62 = vector.broadcast %c-1_i32_23 : i32 to vector<16x1xi32>
    %63 = arith.addi %0, %62 : vector<16x1xi32>
    %c0_i32_24 = arith.constant 0 : i32
    %64 = vector.broadcast %c0_i32_24 : i32 to vector<16x1xi32>
    %65 = arith.cmpi sge, %63, %64 : vector<16x1xi32>
    %c-1_i32_25 = arith.constant -1 : i32
    %66 = vector.broadcast %c-1_i32_25 : i32 to vector<16x1xi32>
    %67 = arith.addi %0, %66 : vector<16x1xi32>
    %c16_i32_26 = arith.constant 16 : i32
    %68 = vector.broadcast %c16_i32_26 : i32 to vector<16x1xi32>
    %69 = arith.cmpi slt, %67, %68 : vector<16x1xi32>
    %70 = arith.andi %65, %69 : vector<16x1xi1>
    %cst_27 = arith.constant 0.000000e+00 : f32
    %71 = vector.broadcast %cst_27 : f32 to vector<16x1xf32>
    %72 = arith.select %70, %61, %71 : vector<16x1xi1>, vector<16x1xf32>
    %c0_28 = arith.constant 0 : index
    %73 = memref.load %arg1[%c0_28] : memref<3xf32, #tpu.memory_space<smem>>
    %74 = vector.broadcast %73 : f32 to vector<16x1xf32>
    %75 = arith.mulf %74, %72 : vector<16x1xf32>
    %76 = arith.addf %60, %75 : vector<16x1xf32>
    %c1_29 = arith.constant 1 : index
    %77 = memref.load %arg1[%c1_29] : memref<3xf32, #tpu.memory_space<smem>>
    %78 = vector.broadcast %77 : f32 to vector<16x1xf32>
    %79 = arith.mulf %78, %59 : vector<16x1xf32>
    %80 = arith.addf %76, %79 : vector<16x1xf32>
    %c15_i32_30 = arith.constant 15 : i32
    %81 = tpu.dynamic_rotate %59 by %c15_i32_30 dim 0 : vector<16x1xf32>, i32 -> vector<16x1xf32>
    %c1_i32_31 = arith.constant 1 : i32
    %82 = vector.broadcast %c1_i32_31 : i32 to vector<16x1xi32>
    %83 = arith.addi %0, %82 : vector<16x1xi32>
    %c0_i32_32 = arith.constant 0 : i32
    %84 = vector.broadcast %c0_i32_32 : i32 to vector<16x1xi32>
    %85 = arith.cmpi sge, %83, %84 : vector<16x1xi32>
    %c1_i32_33 = arith.constant 1 : i32
    %86 = vector.broadcast %c1_i32_33 : i32 to vector<16x1xi32>
    %87 = arith.addi %0, %86 : vector<16x1xi32>
    %c16_i32_34 = arith.constant 16 : i32
    %88 = vector.broadcast %c16_i32_34 : i32 to vector<16x1xi32>
    %89 = arith.cmpi slt, %87, %88 : vector<16x1xi32>
    %90 = arith.andi %85, %89 : vector<16x1xi1>
    %cst_35 = arith.constant 0.000000e+00 : f32
    %91 = vector.broadcast %cst_35 : f32 to vector<16x1xf32>
    %92 = arith.select %90, %81, %91 : vector<16x1xi1>, vector<16x1xf32>
    %c2_36 = arith.constant 2 : index
    %93 = memref.load %arg1[%c2_36] : memref<3xf32, #tpu.memory_space<smem>>
    %94 = vector.broadcast %93 : f32 to vector<16x1xf32>
    %95 = arith.mulf %94, %92 : vector<16x1xf32>
    %96 = arith.addf %80, %95 : vector<16x1xf32>
    %97 = arith.negf %96 : vector<16x1xf32>
    %98 = math.exp %97 : vector<16x1xf32>
    %cst_37 = arith.constant 1.000000e+00 : f32
    %99 = vector.broadcast %cst_37 : f32 to vector<16x1xf32>
    %100 = arith.addf %99, %98 : vector<16x1xf32>
    %101 = arith.divf %99, %100 : vector<16x1xf32>
    %102 = vector.broadcast %101 : vector<16x1xf32> to vector<16x256xf32>
    %103 = arith.mulf %55, %102 : vector<16x256xf32>
    %c1_38 = arith.constant 1 : index
    %c0_39 = arith.constant 0 : index
    %c0_40 = arith.constant 0 : index
    %104 = vector.load %arg3[%c1_38, %c0_39, %c0_40] : memref<2x16x256xf32, #tpu.memory_space<vmem>>, vector<1x16x256xf32>
    %105 = vector.shape_cast %104 : vector<1x16x256xf32> to vector<16x256xf32>
    %106 = vector.shape_cast %103 : vector<16x256xf32> to vector<1x16x256xf32>
    tpu.vector_store %arg3[%c1_38, %c0_39, %c0_40], %106 {strides = array<i32>} : memref<2x16x256xf32, #tpu.memory_space<vmem>>, vector<1x16x256xf32>,
    return
  }
  func.func @transform_0(%arg0: i32, %arg1: memref<3xf32, #tpu.memory_space<smem>>) -> (i32, i32, i32) {
    %c0_i32 = arith.constant 0 : i32
    %c0_i32_0 = arith.constant 0 : i32
    %c0_i32_1 = arith.constant 0 : i32
    %c0_i32_2 = arith.constant 0 : i32
    return %c0_i32, %c0_i32_0, %c0_i32_1 : i32, i32, i32
  }
  func.func @transform_1(%arg0: i32, %arg1: memref<3xf32, #tpu.memory_space<smem>>) -> (i32, i32, i32) {
    %c0_i32 = arith.constant 0 : i32
    %c0_i32_0 = arith.constant 0 : i32
    %c0_i32_1 = arith.constant 0 : i32
    %c0_i32_2 = arith.constant 0 : i32
    return %c0_i32, %c0_i32_0, %c0_i32_1 : i32, i32, i32
  }
}

</mosaic_0001>

<bundles_post_ra>
// kernel: tpu_custom_call.1
= control target key start
LH: loop header
LB: loop body
LE: loop exit
PB: predicated region body
PF: predicated region fallthrough
CT: control target
= control target key end

     0   :  { %s406_s0 = inlined_call_operand.vmem [shape: f32[3], index: 0, kind: input, shape index: {}]   ;;  %s407_s1 = inlined_call_operand.hbm [shape: f32[2,16,256], index: 1, kind: input, shape index: {}, may-alias: {1,2}]   ;;  %s408_s2 = inlined_call_operand.hbm [shape: f32[2,16,256], index: 2, kind: output, shape index: {}, may-alias: {1,2}]  }
   0x1   :  { %s7_s11 = sshll.u32 %s406_s0, 4  ;;  %s8_s11 = int_to_ptr.vmem [resolvable:$true] %s7_s11 }
   0x2   :  { %s246_s12 = scalar_lea.vmem %s8_s11, 16  ;;  %p251_p1 = scmp.lt.s32.totalorder %s8_s11, %s8_s11 }
   0x3   :  { %p247_p0 = scmp.ne.s32.totalorder %s8_s11, %s246_s12  ;;  %p252_p2 = scmp.lt.s32.totalorder %s246_s12, %s246_s12 }
   0x5   :  { %p253_p3 = por %p252_p2, %p251_p1 }
   0x7   :  { %p254_p4 = pnand %p253_p3, %p247_p0 }
   0x9   :  { %257 = shalt.err (!%p254_p4)  }
   0xa   :  { %s308_s13 = smov [#allocation3]  }
   0xb   :  { %10 = dma.vmem_to_smem %s8_s11, 16, %s308_s13, [#allocation2] }
   0xc   :  { %302 = dma.done.wait [#allocation2], 16 }
   0xd   :  { %303 = vsyncadd [#allocation2], 4294967280 }
   0xe   :  { %12 = sfence }
   0xf   :  { %13 = vsyncpa [#allocation5], 0 }
  0x10   :  { %14 = vsyncpa [#allocation6], 0  ;;  %s309_s14 = smov [#allocation4]   ;;  %s258_s17 = scalar_lea.hbm %s407_s1, 1024 }
  0x11   :  { %s20_s15 = sshll.u32 %s309_s14, 4  ;;  %p259_p5 = scmp.ne.s32.totalorder %s407_s1, %s258_s17  ;;  %s21_s15 = int_to_ptr.vmem [resolvable:$true] %s20_s15 }
  0x12   :  { %p262_p6 = scmp.lt.u32.totalorder %s258_s17, %s407_s1 }
  0x14   :  { %p264_p7 = pnand %p262_p6, %p259_p5 }
  0x16   :  { %267 = shalt.err (!%p264_p7)
}
  0x17   :  { %s268_s22 = scalar_lea.vmem %s21_s15, 1024  ;;  %p273_p9 = scmp.lt.s32.totalorder %s21_s15, %s21_s15 }
  0x18   :  { %p269_p8 = scmp.ne.s32.totalorder %s21_s15, %s268_s22  ;;  %p274_p10 = scmp.lt.s32.totalorder %s268_s22, %s268_s22 }
  0x1a   :  { %p275_p11 = por %p274_p10, %p273_p9 }
  0x1c   :  { %p276_p12 = pnand %p275_p11, %p269_p8 }
  0x1e   :  { %279 = shalt.err (!%p276_p12)
}
  0x1f   :  { %s310_s23 = smov 256   ;;  %s311_s24 = smov 16  }
  0x20   :  { %26 = dma.hbm_to_vmem [thread:$0]  %s407_s1, 1024, %s21_s15, [#allocation5], %s310_s23, %s310_s23, %s311_s24  }
  0x21   :  { %304 = dma.done.wait [#allocation5], 1024  }
  0x22   :  { %305 = vsyncadd [#allocation5], 4294966272  ;;  %v347_v0 = vld [vmem:[#allocation4 + $0x20] sm:$0xff]  ;;  %v349_v1 = vld [vmem:[#allocation4 + $0x28] sm:$0xff]  ;;  %v312_v12 = vmov 0   ;;  %v30_v13 = vlaneseq  ;;  %s218_s1 = sld [smem:[#allocation3 + $0x1]] }
  0x23   :  { %v351_v2 = vld [vmem:[#allocation4] sm:$0xff]  ;;  %v128_v3 = vadd.f32 %v349_v1, %v347_v0  ;;  %v355_v4 = vld [vmem:[#allocation4 + $0x8] sm:$0xff]  ;;  %v357_v5 = vld [vmem:[#allocation4 + $0x30] sm:$0xff]  ;;  %229 = vset.pattern.permute.xlu1 %v312_v12  ;;  %228 = vset.pattern.permute.xlu0 %v312_v12  ;;  %s142_s27 = sld [smem:[#allocation3]]  ;;  %s219_s28 = sld [smem:[#allocation3 + $0x2]] }
  0x24   :  { %v359_v6 = vld [vmem:[#allocation4 + $0x38] sm:$0xff]  ;;  %v37_v7 = vadd.f32 %v355_v4, %v351_v2  ;;  %v363_v8 = vld [vmem:[#allocation4 + $0x10] sm:$0xff]  ;;  %v31_v14 = vshrl.u32 %v30_v13, 7  ;;  %s313_s29 = smov [#allocation7]  }
  0x25   :  { %v365_v9 = vld [vmem:[#allocation4 + $0x18] sm:$0xff]  ;;  %129 = vadd.xlane.f32.xlu1 %v128_v3  ;;  %v131_v10 = vadd.f32 %v359_v6, %v357_v5  ;;  %s202_s30 = sshll.u32 %s313_s29, 4  ;;  %s203_s30 = int_to_ptr.vmem [resolvable:$true] %s202_s30 }
  0x26   :  { %38 = vadd.xlane.f32.xlu0 %v37_v7  ;;  %v40_v11 = vadd.f32 %v365_v9, %v363_v8  ;;  %v32_v15 = vadd.s32 8, %v31_v14  ;;  %v50_v19 = vadd.s32 4294967295, %v31_v14  ;;  %vm47_vm0 = vcmp.lt.s32.totalorder %v31_v14, 1  ;;  %s280_s3 = scalar_lea.vmem %s203_s30, 1024  ;;  %p285_p0 = scmp.lt.s32.totalorder %s203_s30, %s203_s30 }
  0x27   :  { %vm74_vm1 = vcmp.lt.s32.totalorder %v31_v14, 7  ;;  %p281_p13 = scmp.ne.s32.totalorder %s203_s30, %s280_s3  ;;  %p286_p1 = scmp.lt.s32.totalorder %s280_s3, %s280_s3 }
  0x28   :  { %v78_v20 = vadd.s32 1, %v32_v15  ;;  %v149_v21 = vstv %s218_s1  ;;  %vm52_vm2 = vcmp.ge.s32.totalorder %v50_v19, 0 }
  0x29   :  { %132 = vadd.xlane.f32.xlu1 %v131_v10  ;;  %v143_v28 = vstv %s142_s27  ;;  %v161_v31 = vstv %s219_s28  ;;  %p287_p2 = por %p286_p1, %p285_p0 }
  0x2a   :  { %41 = vadd.xlane.f32.xlu0 %v40_v11  ;;  %vm82_vm3 = vcmp.lt.s32.totalorder %v78_v20, 16 }
  0x2b   :  { %p288_p3 = pnand %p287_p2, %p281_p13 }
  0xb2   :  { %v130_v16 = vpop.xlane.xlu1 %129 }
  0xb3   :  { %v134_v17 = vmul.f32 0.00390625, %v130_v16  ;;  %v39_v18 = vpop.xlane.xlu0 %38 }
  0xb4   :  { %v43_v22 = vmul.f32 0.00390625, %v39_v18 }
  0xb5   :  { %v136_v24 = vrot.slane %v134_v17, 7  ;;  %v154_v25 = vrot.slane %v134_v17, 1  ;;  %v150_v30 = vmul.f32 %v149_v21, %v134_v17 }
  0xb6   :  { %v133_v23 = vpop.xlane.xlu1 %132  ;;  %v45_v34 = vrot.slane %v43_v22, 7  ;;  %v68_v35 = vmul.f32 %v149_v21, %v43_v22  ;;  %v72_v38 = vrot.slane %v43_v22, 1 }
  0xb7   :  { %v135_v26 = vmul.f32 0.00390625, %v133_v23  ;;  %v42_v27 = vpop.xlane.xlu0 %41 }
  0xb8   :  { %v44_v29 = vmul.f32 0.00390625, %v42_v27 }
  0xb9   :  { %v137_v32 = vrot.slane %v135_v26, 7  ;;  %v155_v33 = vrot.slane %v135_v26, 1  ;;  %v151_v44 = vmul.f32 %v149_v21, %v135_v26 }
  0xba   :  { %v46_v36 = vrot.slane %v44_v29, 7  ;;  %v73_v37 = vrot.slane %v44_v29, 1  ;;  %v69_v52 = vmul.f32 %v149_v21, %v44_v29 }
  0xbb   :  { %v138_v39 = vsel %vm47_vm0, %v136_v24, %v137_v32  ;;  %v139_v40 = vsel %vm47_vm0, %v137_v32, %v136_v24  ;;  %v157_v41 = vsel %vm74_vm1, %v155_v33, %v154_v25  ;;  %v156_v45 = vsel %vm74_vm1, %v154_v25, %v155_v33 }
  0xbc   :  { %v140_v42 = vsel %vm52_vm2, %v139_v40, 0.0  ;;  %v145_v43 = vmul.f32 %v143_v28, %v138_v39  ;;  %v159_v47 = vsel %vm82_vm3, %v157_v41, 0.0  ;;  %v48_v48 = vsel %vm47_vm0, %v45_v34, %v46_v36 }
  0xbd   :  { %v144_v46 = vmul.f32 %v143_v28, %v140_v42  ;;  %v49_v49 = vsel %vm47_vm0, %v46_v36, %v45_v34  ;;  %v63_v51 = vmul.f32 %v143_v28, %v48_v48  ;;  %v75_v53 = vsel %vm74_vm1, %v72_v38, %v73_v37 }
  0xbe   :  { %v58_v50 = vsel %vm52_vm2, %v49_v49, 0.0  ;;  %v162_v55 = vmul.f32 %v161_v31, %v156_v45  ;;  %v76_v57 = vsel %vm74_vm1, %v73_v37, %v72_v38  ;;  %v153_v58 = vadd.f32 %v151_v44, %v145_v43 }
  0xbf   :  { %v152_v54 = vadd.f32 %v150_v30, %v144_v46  ;;  %v62_v56 = vmul.f32 %v143_v28, %v58_v50  ;;  %v163_v59 = vmul.f32 %v161_v31, %v159_v47  ;;  %v71_v60 = vadd.f32 %v69_v52, %v63_v51 }
  0xc0   :  { %v86_v61 = vsel %vm82_vm3, %v76_v57, 0.0  ;;  %v89_v3 = vmul.f32 %v161_v31, %v75_v53 }
  0xc1   :  { %v164_v62 = vadd.f32 %v162_v55, %v152_v54  ;;  %v70_v63 = vadd.f32 %v68_v35, %v62_v56  ;;  %v90_v7 = vmul.f32 %v161_v31, %v86_v61  ;;  %v165_v13 = vadd.f32 %v163_v59, %v153_v58 }
  0xc3   :  { %v220_v10 = vmul.f32 -1.442695, %v164_v62  ;;  %v91_v11 = vadd.f32 %v89_v3, %v70_v63  ;;  %v92_v12 = vadd.f32 %v90_v7, %v71_v60  ;;  %v221_v17 = vmul.f32 -1.442695, %v165_v13 }
  0xc5   :  { %v216_v15 = vmul.f32 -1.442695, %v91_v11  ;;  %v217_v16 = vmul.f32 -1.442695, %v92_v12  ;;  %230 = vpow2.f32 %v220_v10 }
  0xc7   :  { %232 = vpow2.f32 %v216_v15 }
  0xc8   :  { %234 = vpow2.f32 %v217_v16 }
  0xc9   :  { %236 = vpow2.f32 %v221_v17 }
  0xcf   :  { %v231_v14 = vpop.eup %230 }
  0xd0   :  { %v172_v22 = vadd.f32 1.0, %v231_v14 }
  0xd1   :  { %v233_v18 = vpop.eup %232 }
  0xd2   :  { %v235_v19 = vpop.eup %234  ;;  %v99_v20 = vadd.f32 1.0, %v233_v18 }
  0xd3   :  { %v100_v21 = vadd.f32 1.0, %v235_v19  ;;  %v237_v23 = vpop.eup %236 }
  0xd4   :  { %238 = vrcp.f32 %v99_v20  ;;  %v173_v24 = vadd.f32 1.0, %v237_v23 }
  0xd5   :  { %240 = vrcp.f32 %v100_v21 }
  0xd6   :  { %242 = vrcp.f32 %v172_v22 }
  0xd7   :  { %244 = vrcp.f32 %v173_v24 }
  0xde   :  { %v239_v25 = vpop.eup %238 }
  0xdf   :  { %v241_v26 = vpop.eup %240  ;;  %107 = vperm.xlu0 %228, %v239_v25  }
  0xe0   :  { %112 = vperm.xlu1 %229, %v241_v26   ;;  %v243_v27 = vpop.eup %242 }
  0xe1   :  { %v245_v28 = vpop.eup %244 }
  0xe4   :  { %180 = vperm.xlu1 %229, %v243_v27  }
  0xe8   :  { %185 = vperm.xlu1 %229, %v245_v28  }
 0x15e   :  { %v108_v29 = vpop.permute.xlu0 %107 }
 0x15f   :  { %v113_v30 = vpop.permute.xlu1 %112  ;;  %v115_v31 = vmul.f32 %v108_v29, %v351_v2  ;;  %v116_v32 = vmul.f32 %v108_v29, %v355_v4 }
 0x160   :  { %v117_v33 = vmul.f32 %v113_v30, %v363_v8  ;;  %v118_v34 = vmul.f32 %v113_v30, %v365_v9 }
 0x161   :  { %119 = vst [vmem:[#allocation7] sm:$0xff] %v115_v31  ;;  %120 = vst [vmem:[#allocation7 + $0x8] sm:$0xff] %v116_v32 }
 0x162   :  { %121 = vst [vmem:[#allocation7 + $0x10] sm:$0xff] %v117_v33  ;;  %122 = vst [vmem:[#allocation7 + $0x18] sm:$0xff] %v118_v34 }
 0x163   :  { %v181_v35 = vpop.permute.xlu1 %180 }
 0x164   :  { %v188_v36 = vmul.f32 %v181_v35, %v347_v0  ;;  %v189_v37 = vmul.f32 %v181_v35, %v349_v1 }
 0x166   :  { %193 = vst [vmem:[#allocation7 + $0x20] sm:$0xff] %v188_v36  ;;  %194 = vst [vmem:[#allocation7 + $0x28] sm:$0xff] %v189_v37 }
 0x167   :  { %v186_v2 = vpop.permute.xlu1 %185 }
 0x168   :  { %v190_v4 = vmul.f32 %v186_v2, %v357_v5  ;;  %v191_v8 = vmul.f32 %v186_v2, %v359_v6 }
 0x16a   :  { %195 = vst [vmem:[#allocation7 + $0x30] sm:$0xff] %v190_v4  ;;  %196 = vst [vmem:[#allocation7 + $0x38] sm:$0xff] %v191_v8 }
 0x16b   :  { %291 = shalt.err (!%p288_p3)
}
 0x16c   :  { %s292_s6 = scalar_lea.hbm %s408_s2, 1024 }
 0x16d   :  { %p293_p4 = scmp.ne.s32.totalorder %s408_s2, %s292_s6  ;;  %p296_p5 = scmp.lt.u32.totalorder %s292_s6, %s408_s2 }
 0x16f   :  { %p298_p6 = pnand %p296_p5, %p293_p4 }
 0x171   :  { %301 = shalt.err (!%p298_p6)
}
 0x172   :  { %208 = dma.vmem_to_hbm [thread:$0]  %s203_s30, 1024, %s408_s2, [#allocation6], %s310_s23, %s310_s23, %s311_s24  }
 0x173   :  { %306 = dma.done.wait [#allocation6], 1024  }
 0x174   :  { %307 = vsyncadd [#allocation6], 4294966272 }
 0x175   :  { %212 = vsyncpa [#allocation5], 1 }
 0x176   :  { %213 = vsyncpa [#allocation6], 1 }

</bundles_post_ra>
